<compile_context>
chip_gen: v6e
topology: v6e:2x2x1
jax: 0.10.0
libtpu: 0.0.40
codegen_flags: <defaults>
</compile_context>

<pallas_src>
import math
import functools

import jax
import jax.numpy as jnp
from jax.experimental import pallas as pl
from jax.experimental.pallas import tpu as pltpu


# ----------------------------------------------------------------------------
# PE buffer construction (plain JAX glue — matches PositionalEncoding2D.__init__)
# ----------------------------------------------------------------------------
def make_pe_buffer(dim: int, nrow: int, ncol: int) -> jnp.ndarray:
    assert dim % 4 == 0
    max_len = max(nrow, ncol)
    halfdim = dim // 2
    position = jnp.arange(0, max_len, dtype=jnp.float32)[:, None]          # (max_len, 1)
    div_term = jnp.exp(
        jnp.arange(0, halfdim, 2, dtype=jnp.float32)
        * -(math.log(max_len ** 2) / halfdim)
    )
    pe = jnp.zeros((max_len, halfdim), dtype=jnp.float32)
    pe = pe.at[:, 0::2].set(jnp.sin(position * div_term))
    pe = pe.at[:, 1::2].set(jnp.cos(position * div_term))
    return pe


def make_pe_slab(dim: int, nrow: int, ncol: int) -> jnp.ndarray:
    """Batch-invariant PE slab (nrow, ncol, dim) = concat([pe_rows, pe_cols], -1)."""
    pe = make_pe_buffer(dim, nrow, ncol)
    halfdim = dim // 2
    pe_r = jnp.broadcast_to(pe[:nrow][:, None, :], (nrow, ncol, halfdim))
    pe_c = jnp.broadcast_to(pe[:ncol][None, :, :], (nrow, ncol, halfdim))
    return jnp.concatenate([pe_r, pe_c], axis=-1)          # (nrow, ncol, dim), f32


# ----------------------------------------------------------------------------
# Kernels (bandwidth-only: dense stores + VPU add; no MXU, no in-kernel concat)
# ----------------------------------------------------------------------------
def _pe2d_concat_kernel(x_ref, pe_ref, o_ref, *, ncol, dim):
    # Lane-dense:
    #   x_ref:  (Bt, TR, ncol*dim)
    #   pe_ref: (TR, ncol*2*dim)  widened template: lanes [c*2d, c*2d+d) are zero,
    #                             lanes [c*2d+d, (c+1)*2d) hold pe[r, c, :]
    #   o_ref:  (Bt, TR, ncol*2*dim)
    two_d = 2 * dim
    bt, tr = x_ref.shape[0], x_ref.shape[1]
    if dim % 128 == 0:
        # Per-column slices are already full-lane dense: write each byte once.
        pe = pe_ref[...]
        for c in range(ncol):
            o_ref[:, :, c * two_d: c * two_d + dim] = x_ref[:, :, c * dim:(c + 1) * dim]
            o_ref[:, :, c * two_d + dim: (c + 1) * two_d] = jnp.broadcast_to(
                pe[None, :, c * two_d + dim: (c + 1) * two_d], (bt, tr, dim))
    else:
        # One dense full-width store of the PE template (no temporary), then
        # overwrite the x slots with narrow static slice stores.
        o_ref[...] = jnp.broadcast_to(pe_ref[...][None], o_ref.shape)
        for c in range(ncol):
            o_ref[:, :, c * two_d: c * two_d + dim] = x_ref[:, :, c * dim:(c + 1) * dim]


def _pe2d_add_kernel(x_ref, pe_ref, o_ref):
    # x_ref: (Bt, TR, ncol*dim), pe_ref: (TR, ncol*dim), o_ref: (Bt, TR, ncol*dim)
    x = x_ref[...].astype(jnp.float32)
    pe = pe_ref[...].astype(jnp.float32)
    o_ref[...] = (x + pe[None]).astype(o_ref.dtype)


# ----------------------------------------------------------------------------
# Tile selection (padding-aware: blocks are lane-dense so bytes == VMEM bytes)
# ----------------------------------------------------------------------------
_DEFAULT_TARGET_TILE_BYTES = 2 * 1024 * 1024   # ~2 MiB input tile (mem-bound sweet spot)
_VMEM_TILE_BUDGET = 26 * 1024 * 1024           # double-buffered working-set target
_VMEM_LIMIT_CAP = 32 * 1024 * 1024             # headroom below v7x's 64 MiB physical


def _sublane_quantum(itemsize: int) -> int:
    return {4: 8, 2: 16, 1: 32}.get(itemsize, 8)


def _pick_tiles(B, nrow, in_row_bytes, out_row_bytes, pe_row_bytes, q, target_bytes):
    """Returns (Bt, TR, vmem_need_bytes). TR is a multiple of q or == nrow."""
    per_image_in = nrow * in_row_bytes

    def need(bt, tr):
        # 2x double-buffered (in + out) blocks + 2x the resident PE block.
        return 2 * bt * tr * (in_row_bytes + out_row_bytes) + 2 * tr * pe_row_bytes

    if per_image_in <= target_bytes:
        bt = max(1, target_bytes // per_image_in)
        if B >= 2:
            bt = min(bt, (B + 1) // 2)     # keep >=2 batch tiles: pipelining + 2nd TC
        bt = min(bt, B)
        tr = nrow
        if B == 1 and nrow >= 2 * q:
            tr = max(q, ((nrow // 2) // q) * q)   # still split work when batch is 1
    else:
        bt = 1
        if nrow <= q:
            tr = nrow
        else:
            tr = max(q, (target_bytes // max(in_row_bytes, 1)) // q * q)
            if tr >= nrow:
                tr = nrow

    # Shrink until the double-buffered working set fits the budget.
    while need(bt, tr) > _VMEM_TILE_BUDGET:
        if bt > 1:
            bt = max(1, bt // 2)
            continue
        new_tr = max(q, ((tr // 2) // q) * q)
        if new_tr >= tr:
            break
        tr = new_tr

    return bt, tr, need(bt, tr)


# ----------------------------------------------------------------------------
# Wrapper (mirrors PositionalEncoding2D.forward)
# ----------------------------------------------------------------------------
@functools.partial(
    jax.jit,
    static_argnames=("dim", "nrow", "ncol", "concat", "target_tile_bytes", "alias_input"))
def positional_encoding_2d(x, *, dim: int, nrow: int, ncol: int, concat: bool = True,
                           target_tile_bytes: int = _DEFAULT_TARGET_TILE_BYTES,
                           alias_input: bool = False):
    """
    x: [..., nrow, ncol, dim]  (dtype preserved)
    returns: [..., nrow, ncol, 2*dim] if concat else [..., nrow, ncol, dim]
    """
    assert x.shape[-3:] == (nrow, ncol, dim)
    batch_shape = x.shape[:-3]
    dtype = x.dtype
    itemsize = dtype.itemsize
    q = _sublane_quantum(itemsize)

    B = 1
    for s in batch_shape:
        B *= int(s)
    B = max(B, 1)

    L = ncol * dim
    x2 = x.reshape(B, nrow, L)                                    # lane-dense, native dtype
    pe_slab = make_pe_slab(dim, nrow, ncol).astype(dtype)         # (nrow, ncol, dim)

    out_dim = 2 * dim if concat else dim
    in_row_bytes = L * itemsize
    out_row_bytes = ncol * out_dim * itemsize
    pe_row_bytes = out_row_bytes if concat else in_row_bytes

    Bt, TR, vmem_need = _pick_tiles(B, nrow, in_row_bytes, out_row_bytes,
                                    pe_row_bytes, q, target_tile_bytes)
    # Rows outer, batch inner: PE block index is constant across the inner loop,
    # so the slab stays VMEM-resident (no re-DMA per grid step).
    grid = (pl.cdiv(nrow, TR), pl.cdiv(B, Bt))

    cparams = pltpu.CompilerParams(
        dimension_semantics=("parallel", "parallel"),
        vmem_limit_bytes=int(min(max(vmem_need * 5 // 4 + (2 << 20), 16 << 20),
                                 _VMEM_LIMIT_CAP)),
    )

    if concat:
        # Widened template: zeros in the x slots, pe values in the pe slots.
        pe_wide = jnp.concatenate(
            [jnp.zeros((nrow, ncol, dim), dtype=dtype), pe_slab], axis=-1
        ).reshape(nrow, 2 * L)
        out2 = pl.pallas_call(
            functools.partial(_pe2d_concat_kernel, ncol=ncol, dim=dim),
            out_shape=jax.ShapeDtypeStruct((B, nrow, 2 * L), dtype),
            grid_spec=pltpu.PrefetchScalarGridSpec(
                num_scalar_prefetch=0,
                grid=grid,
                in_specs=[
                    pl.BlockSpec((Bt, TR, L), lambda r, b: (b, r, 0)),
                    pl.BlockSpec((TR, 2 * L), lambda r, b: (r, 0)),
                ],
                out_specs=pl.BlockSpec((Bt, TR, 2 * L), lambda r, b: (b, r, 0)),
            ),
            compiler_params=cparams,
        )(x2, pe_wide)
        return out2.reshape(*batch_shape, nrow, ncol, 2 * dim)

    # Additive path (same shape/dtype in and out; optional aliasing if x is donatable).
    pe2 = pe_slab.reshape(nrow, L)
    out2 = pl.pallas_call(
        _pe2d_add_kernel,
        out_shape=jax.ShapeDtypeStruct((B, nrow, L), dtype),
        grid_spec=pltpu.PrefetchScalarGridSpec(
            num_scalar_prefetch=0,
            grid=grid,
            in_specs=[
                pl.BlockSpec((Bt, TR, L), lambda r, b: (b, r, 0)),
                pl.BlockSpec((TR, L), lambda r, b: (r, 0)),
            ],
            out_specs=pl.BlockSpec((Bt, TR, L), lambda r, b: (b, r, 0)),
        ),
        compiler_params=cparams,
        input_output_aliases=({0: 0} if alias_input else {}),
    )(x2, pe2)
    return out2.reshape(*batch_shape, nrow, ncol, dim)


# ----------------------------------------------------------------------------
# Pure-JAX reference (direct transcription of the PyTorch forward)
# ----------------------------------------------------------------------------
def positional_encoding_2d_ref(x, *, dim, nrow, ncol, concat=True):
    batch_shape = x.shape[:-3]
    x_flat = x.reshape((-1, nrow, ncol, dim))
    B = x_flat.shape[0]
    pe = make_pe_buffer(dim, nrow, ncol)
    pe_rows = jnp.broadcast_to(pe[:nrow][None, :, None, :], (B, nrow, ncol, dim // 2))
    pe_cols = jnp.broadcast_to(pe[:ncol][None, None, :, :], (B, nrow, ncol, dim // 2))
    pe_full = jnp.concatenate([pe_rows, pe_cols], axis=-1).astype(x.dtype)
    if concat:
        out = jnp.concatenate([x_flat, pe_full], axis=-1)
    else:
        out = x_flat + pe_full
    return out.reshape(*batch_shape, nrow, ncol, out.shape[-1])


if __name__ == "__main__":
    key = jax.random.PRNGKey(0)

    # 1) Small shapes (dim % 4 == 0): batch-blocked path, grid=(1, 2).
    dim, nrow, ncol = 16, 8, 8
    batch_shape = (2, 3)
    x = jax.random.normal(key, (*batch_shape, nrow, ncol, dim), dtype=jnp.float32)

    out = positional_encoding_2d(x, dim=dim, nrow=nrow, ncol=ncol, concat=True)
    out = jax.block_until_ready(out)
    ref = positional_encoding_2d_ref(x, dim=dim, nrow=nrow, ncol=ncol, concat=True)
    assert out.shape == (*batch_shape, nrow, ncol, 2 * dim), out.shape
    assert out.dtype == x.dtype
    assert jnp.allclose(out, ref, atol=1e-6, rtol=1e-6), "concat=True mismatch"

    out_add = positional_encoding_2d(x, dim=dim, nrow=nrow, ncol=ncol, concat=False)
    out_add = jax.block_until_ready(out_add)
    ref_add = positional_encoding_2d_ref(x, dim=dim, nrow=nrow, ncol=ncol, concat=False)
    assert out_add.shape == (*batch_shape, nrow, ncol, dim), out_add.shape
    assert jnp.allclose(out_add, ref_add, atol=1e-6, rtol=1e-6), "concat=False mismatch"

    # 2) Row-tiled path (TR < nrow) forced via a tiny target tile: grid=(2, 2).
    dim2, nrow2, ncol2 = 16, 16, 8
    x2 = jax.random.normal(jax.random.PRNGKey(1), (2, nrow2, ncol2, dim2), dtype=jnp.float32)
    for cc in (True, False):
        o = positional_encoding_2d(x2, dim=dim2, nrow=nrow2, ncol=ncol2, concat=cc,
                                   target_tile_bytes=4096)
        o = jax.block_until_ready(o)
        r = positional_encoding_2d_ref(x2, dim=dim2, nrow=nrow2, ncol=ncol2, concat=cc)
        assert jnp.allclose(o, r, atol=1e-6, rtol=1e-6), f"row-tiled concat={cc} mismatch"

    # 3) Ragged batch grid (B=3, Bt=2 -> cdiv last block partially out of bounds).
    x3 = jax.random.normal(jax.random.PRNGKey(2), (3, nrow, ncol, dim), dtype=jnp.float32)
    for cc in (True, False):
        o = positional_encoding_2d(x3, dim=dim, nrow=nrow, ncol=ncol, concat=cc)
        o = jax.block_until_ready(o)
        r = positional_encoding_2d_ref(x3, dim=dim, nrow=nrow, ncol=ncol, concat=cc)
        assert jnp.allclose(o, r, atol=1e-6, rtol=1e-6), f"ragged-batch concat={cc} mismatch"

    print("KERNEL_OK")
</pallas_src>

<mosaic_0001>
module attributes {stable_mosaic.version = 11 : i64} {
  func.func @_pe2d_concat_kernel(%arg0: i32, %arg1: i32, %arg2: memref<3x8x128xf32, #tpu.memory_space<vmem>>, %arg3: memref<8x256xf32, #tpu.memory_space<vmem>>, %arg4: memref<3x8x256xf32, #tpu.memory_space<vmem>>) attributes {dimension_semantics = [#tpu.dimension_semantics<parallel>, #tpu.dimension_semantics<parallel>], iteration_bounds = array<i64: 1, 2>, scalar_prefetch = 0 : i64, scratch_operands = 0 : i64, tpu.core_type = #tpu.core_type<tc>, window_params = [{transform_indices = @transform_0, window_bounds = array<i64: 3, 8, 128>}, {transform_indices = @transform_1, window_bounds = array<i64: 8, 256>}, {transform_indices = @transform_2, window_bounds = array<i64: 3, 8, 256>}]} {
    %c0 = arith.constant 0 : index
    %c0_0 = arith.constant 0 : index
    %0 = vector.load %arg3[%c0, %c0_0] : memref<8x256xf32, #tpu.memory_space<vmem>>, vector<8x256xf32>
    %1 = vector.shape_cast %0 : vector<8x256xf32> to vector<1x8x256xf32>
    %2 = vector.shape_cast %1 : vector<1x8x256xf32> to vector<1x8x256xf32>
    %3 = vector.broadcast %2 : vector<1x8x256xf32> to vector<3x8x256xf32>
    %c0_1 = arith.constant 0 : index
    %c0_2 = arith.constant 0 : index
    %c0_3 = arith.constant 0 : index
    %4 = vector.load %arg4[%c0_1, %c0_2, %c0_3] : memref<3x8x256xf32, #tpu.memory_space<vmem>>, vector<3x8x256xf32>
    tpu.vector_store %arg4[%c0_1, %c0_2, %c0_3], %3 {strides = array<i32>} : memref<3x8x256xf32, #tpu.memory_space<vmem>>, vector<3x8x256xf32>,
    %c0_4 = arith.constant 0 : index
    %c0_5 = arith.constant 0 : index
    %c0_6 = arith.constant 0 : index
    %5 = vector.load %arg2[%c0_4, %c0_5, %c0_6] : memref<3x8x128xf32, #tpu.memory_space<vmem>>, vector<3x8x16xf32>
    %c0_7 = arith.constant 0 : index
    %c0_8 = arith.constant 0 : index
    %c0_9 = arith.constant 0 : index
    %6 = vector.load %arg4[%c0_7, %c0_8, %c0_9] : memref<3x8x256xf32, #tpu.memory_space<vmem>>, vector<3x8x16xf32>
    tpu.vector_store %arg4[%c0_7, %c0_8, %c0_9], %5 {strides = array<i32>} : memref<3x8x256xf32, #tpu.memory_space<vmem>>, vector<3x8x16xf32>,
    %c0_10 = arith.constant 0 : index
    %c0_11 = arith.constant 0 : index
    %c16 = arith.constant 16 : index
    %7 = vector.load %arg2[%c0_10, %c0_11, %c16] : memref<3x8x128xf32, #tpu.memory_space<vmem>>, vector<3x8x16xf32>
    %c0_12 = arith.constant 0 : index
    %c0_13 = arith.constant 0 : index
    %c32 = arith.constant 32 : index
    %8 = vector.load %arg4[%c0_12, %c0_13, %c32] : memref<3x8x256xf32, #tpu.memory_space<vmem>>, vector<3x8x16xf32>
    tpu.vector_store %arg4[%c0_12, %c0_13, %c32], %7 {strides = array<i32>} : memref<3x8x256xf32, #tpu.memory_space<vmem>>, vector<3x8x16xf32>,
    %c0_14 = arith.constant 0 : index
    %c0_15 = arith.constant 0 : index
    %c32_16 = arith.constant 32 : index
    %9 = vector.load %arg2[%c0_14, %c0_15, %c32_16] : memref<3x8x128xf32, #tpu.memory_space<vmem>>, vector<3x8x16xf32>
    %c0_17 = arith.constant 0 : index
    %c0_18 = arith.constant 0 : index
    %c64 = arith.constant 64 : index
    %10 = vector.load %arg4[%c0_17, %c0_18, %c64] : memref<3x8x256xf32, #tpu.memory_space<vmem>>, vector<3x8x16xf32>
    tpu.vector_store %arg4[%c0_17, %c0_18, %c64], %9 {strides = array<i32>} : memref<3x8x256xf32, #tpu.memory_space<vmem>>, vector<3x8x16xf32>,
    %c0_19 = arith.constant 0 : index
    %c0_20 = arith.constant 0 : index
    %c48 = arith.constant 48 : index
    %11 = vector.load %arg2[%c0_19, %c0_20, %c48] : memref<3x8x128xf32, #tpu.memory_space<vmem>>, vector<3x8x16xf32>
    %c0_21 = arith.constant 0 : index
    %c0_22 = arith.constant 0 : index
    %c96 = arith.constant 96 : index
    %12 = vector.load %arg4[%c0_21, %c0_22, %c96] : memref<3x8x256xf32, #tpu.memory_space<vmem>>, vector<3x8x16xf32>
    tpu.vector_store %arg4[%c0_21, %c0_22, %c96], %11 {strides = array<i32>} : memref<3x8x256xf32, #tpu.memory_space<vmem>>, vector<3x8x16xf32>,
    %c0_23 = arith.constant 0 : index
    %c0_24 = arith.constant 0 : index
    %c64_25 = arith.constant 64 : index
    %13 = vector.load %arg2[%c0_23, %c0_24, %c64_25] : memref<3x8x128xf32, #tpu.memory_space<vmem>>, vector<3x8x16xf32>
    %c0_26 = arith.constant 0 : index
    %c0_27 = arith.constant 0 : index
    %c128 = arith.constant 128 : index
    %14 = vector.load %arg4[%c0_26, %c0_27, %c128] : memref<3x8x256xf32, #tpu.memory_space<vmem>>, vector<3x8x16xf32>
    tpu.vector_store %arg4[%c0_26, %c0_27, %c128], %13 {strides = array<i32>} : memref<3x8x256xf32, #tpu.memory_space<vmem>>, vector<3x8x16xf32>,
    %c0_28 = arith.constant 0 : index
    %c0_29 = arith.constant 0 : index
    %c80 = arith.constant 80 : index
    %15 = vector.load %arg2[%c0_28, %c0_29, %c80] : memref<3x8x128xf32, #tpu.memory_space<vmem>>, vector<3x8x16xf32>
    %c0_30 = arith.constant 0 : index
    %c0_31 = arith.constant 0 : index
    %c160 = arith.constant 160 : index
    %16 = vector.load %arg4[%c0_30, %c0_31, %c160] : memref<3x8x256xf32, #tpu.memory_space<vmem>>, vector<3x8x16xf32>
    tpu.vector_store %arg4[%c0_30, %c0_31, %c160], %15 {strides = array<i32>} : memref<3x8x256xf32, #tpu.memory_space<vmem>>, vector<3x8x16xf32>,
    %c0_32 = arith.constant 0 : index
    %c0_33 = arith.constant 0 : index
    %c96_34 = arith.constant 96 : index
    %17 = vector.load %arg2[%c0_32, %c0_33, %c96_34] : memref<3x8x128xf32, #tpu.memory_space<vmem>>, vector<3x8x16xf32>
    %c0_35 = arith.constant 0 : index
    %c0_36 = arith.constant 0 : index
    %c192 = arith.constant 192 : index
    %18 = vector.load %arg4[%c0_35, %c0_36, %c192] : memref<3x8x256xf32, #tpu.memory_space<vmem>>, vector<3x8x16xf32>
    tpu.vector_store %arg4[%c0_35, %c0_36, %c192], %17 {strides = array<i32>} : memref<3x8x256xf32, #tpu.memory_space<vmem>>, vector<3x8x16xf32>,
    %c0_37 = arith.constant 0 : index
    %c0_38 = arith.constant 0 : index
    %c112 = arith.constant 112 : index
    %19 = vector.load %arg2[%c0_37, %c0_38, %c112] : memref<3x8x128xf32, #tpu.memory_space<vmem>>, vector<3x8x16xf32>
    %c0_39 = arith.constant 0 : index
    %c0_40 = arith.constant 0 : index
    %c224 = arith.constant 224 : index
    %20 = vector.load %arg4[%c0_39, %c0_40, %c224] : memref<3x8x256xf32, #tpu.memory_space<vmem>>, vector<3x8x16xf32>
    tpu.vector_store %arg4[%c0_39, %c0_40, %c224], %19 {strides = array<i32>} : memref<3x8x256xf32, #tpu.memory_space<vmem>>, vector<3x8x16xf32>,
    return
  }
  func.func @transform_0(%arg0: i32, %arg1: i32) -> (i32, i32, i32) {
    %c0_i32 = arith.constant 0 : i32
    %c0_i32_0 = arith.constant 0 : i32
    return %arg1, %arg0, %c0_i32 : i32, i32, i32
  }
  func.func @transform_1(%arg0: i32, %arg1: i32) -> (i32, i32) {
    %c0_i32 = arith.constant 0 : i32
    %c0_i32_0 = arith.constant 0 : i32
    return %arg0, %c0_i32 : i32, i32
  }
  func.func @transform_2(%arg0: i32, %arg1: i32) -> (i32, i32, i32) {
    %c0_i32 = arith.constant 0 : i32
    %c0_i32_0 = arith.constant 0 : i32
    return %arg1, %arg0, %c0_i32 : i32, i32, i32
  }
}

</mosaic_0001>

<bundles_post_ra>
// kernel: positional_encoding_2d.1
= control target key start
LH: loop header
LB: loop body
LE: loop exit
PB: predicated region body
PF: predicated region fallthrough
CT: control target
= control target key end

     0   :  { %s540_s9 = smov 0   ;;  %s542_s10 = smov 0   ;;  %s629_s0 = inlined_call_operand.vmem [shape: f32[6,8,128], index: 0, kind: input, shape index: {}]   ;;  %s630_s1 = inlined_call_operand.vmem [shape: f32[8,256], index: 1, kind: input, shape index: {}]   ;;  %s631_s2 = inlined_call_operand.vmem [shape: f32[6,8,256], index: 2, kind: output, shape index: {}]  }
   0x1   :  { %s544_s11 = smov 0  }
   0x2 LB: > { %s21_s12 = sadd.s32 1, %s512_s10  ;;  %p456_p0 = scmp.ge.s32.totalorder %s516_s11, 1  ;;  %s516_s11 = sphi %s544_s11, %s12_s11   ;;  %s512_s10 = sphi %s542_s10, %s633_s10   ;;  %s508_s9 = sphi %s540_s9, %s632_s9  }
   0x3   : > { %p22_p1 = scmp.ge.s32.totalorder %s21_s12, 2  ;;  %p142_p2 = scmp.lt.s32.totalorder %s516_s11, 3 }
   0x5   : > { %s635_s12 = smov (%p22_p1, %s21_s12), 0  ;;  %p143_p3 = pnand %p456_p0, %p142_p2 }
   0x6   : > { %s177_s13 = smul.u32 (!%p143_p3), 3, %s508_s9  ;;  %s518_s26 = smov (!%p143_p3), 64  }
   0x7   : > { %146 = sbr.rel (%p143_p3) target bundleno = 172 (0xac), region = 28  ;;  %s519_s27 = smov (!%p143_p3), 16  }
   0x8   : > { %p178_p4 = scmp.lt.s32.totalorder (!%p143_p3), %s177_s13, 5  ;;  %s520_s28 = smov (!%p143_p3), 80  }
   0x9   : > { %s521_s29 = smov (!%p143_p3), 32   ;;  %s522_s30 = smov (!%p143_p3), 96  }
   0xa   : > { %s523_s3 = smov (!%p143_p3), 48   ;;  %s524_s4 = smov (!%p143_p3), 112  }
   0xc   : > { %s637_s13 = smov (!%p178_p4, %s177_s13), 5  ;;  %v203_v0 = vld [vmem:[%s630_s1 + $0x8] sm:$0xff]  ;;  %v202_v1 = vld [vmem:[%s630_s1] sm:$0xff]  ;;  %vm213_vm0 = vcmask 130048   ;;  %vm232_vm1 = vcmask 392448   ;;  %vm251_vm2 = vcmask 654848  }
   0xd   : > { %s457_s18 = sshll.u32 %s637_s13, 3  ;;  %s462_s19 = sshll.u32 %s637_s13, 4  ;;  %vm270_vm3 = vcmask 917248  }
   0xe   : > { %s184_s22 = scalar_lea.vmem %s629_s0, %s457_s18  ;;  %s570_s25 = scalar_lea.vmem %s631_s2, %s462_s19 }
   0xf   : > { %v274_v2 = vld [vmem:[%s184_s22] sm:$0xff]  ;;  %v276_v3 = vld [vmem:[%s184_s22 + $0x10] sm:$0xff]  ;;  %205 = vst [vmem:[%s570_s25 + $0x8] sm:$0xff] %v203_v0  ;;  %204 = vst [vmem:[%s570_s25] sm:$0xff] %v202_v1 }
  0x10   : > { %280 = vrot.lane.b32.xlu0 %v274_v2, %s518_s26  ;;  %284 = vrot.lane.b32.xlu1 %v276_v3, %s518_s26  ;;  %207 = vst [vmem:[%s570_s25 + $0x18] sm:$0xff] %v203_v0  ;;  %206 = vst [vmem:[%s570_s25 + $0x10] sm:$0xff] %v202_v1 }
  0x11   : > { %v275_v4 = vld [vmem:[%s184_s22 + $0x8] sm:$0xff]  ;;  %209 = vst [vmem:[%s570_s25 + $0x28] sm:$0xff] %v203_v0  ;;  %208 = vst [vmem:[%s570_s25 + $0x20] sm:$0xff] %v202_v1 }
  0x12   : > { %214 = vst.msk [vmem:[%s570_s25] sm:$0xff] %vm213_vm0, %v274_v2  ;;  %215 = vst.msk [vmem:[%s570_s25 + $0x10] sm:$0xff] %vm213_vm0, %v275_v4 }
  0x13   : > { %216 = vst.msk [vmem:[%s570_s25 + $0x20] sm:$0xff] %vm213_vm0, %v276_v3 }
  0x14   : > { %282 = vrot.lane.b32.xlu0 %v275_v4, %s518_s26  ;;  %223 = vrot.lane.b32.xlu1 %v274_v2, %s519_s27 }
  0x18   : > { %298 = vrot.lane.b32.xlu0 %v274_v2, %s520_s28  ;;  %225 = vrot.lane.b32.xlu1 %v275_v4, %s519_s27 }
  0x1c   : > { %300 = vrot.lane.b32.xlu0 %v275_v4, %s520_s28  ;;  %227 = vrot.lane.b32.xlu1 %v276_v3, %s519_s27 }
  0x20   : > { %302 = vrot.lane.b32.xlu0 %v276_v3, %s520_s28  ;;  %242 = vrot.lane.b32.xlu1 %v274_v2, %s521_s29 }
  0x24   : > { %316 = vrot.lane.b32.xlu0 %v274_v2, %s522_s30  ;;  %244 = vrot.lane.b32.xlu1 %v275_v4, %s521_s29 }
  0x28   : > { %318 = vrot.lane.b32.xlu0 %v275_v4, %s522_s30  ;;  %246 = vrot.lane.b32.xlu1 %v276_v3, %s521_s29 }
  0x2c   : > { %320 = vrot.lane.b32.xlu0 %v276_v3, %s522_s30  ;;  %261 = vrot.lane.b32.xlu1 %v274_v2, %s523_s3 }
  0x30   : > { %334 = vrot.lane.b32.xlu0 %v274_v2, %s524_s4  ;;  %263 = vrot.lane.b32.xlu1 %v275_v4, %s523_s3 }
  0x34   : > { %336 = vrot.lane.b32.xlu0 %v275_v4, %s524_s4  ;;  %265 = vrot.lane.b32.xlu1 %v276_v3, %s523_s3 }
  0x38   : > { %338 = vrot.lane.b32.xlu0 %v276_v3, %s524_s4 }
  0x82   : > { %v281_v5 = vpop.permute.xlu0 %280  ;;  %v285_v6 = vpop.permute.xlu1 %284 }
  0x83   : > { %289 = vst.msk [vmem:[%s570_s25 + $0x8] sm:$0xff] %vm213_vm0, %v281_v5  ;;  %291 = vst.msk [vmem:[%s570_s25 + $0x28] sm:$0xff] %vm213_vm0, %v285_v6 }
  0x86   : > { %v283_v7 = vpop.permute.xlu0 %282  ;;  %v224_v8 = vpop.permute.xlu1 %223 }
  0x87   : > { %290 = vst.msk [vmem:[%s570_s25 + $0x18] sm:$0xff] %vm213_vm0, %v283_v7 }
  0x88   : > { %233 = vst.msk [vmem:[%s570_s25] sm:$0xff] %vm232_vm1, %v224_v8 }
  0x8a   : > { %v299_v9 = vpop.permute.xlu0 %298  ;;  %v226_v10 = vpop.permute.xlu1 %225 }
  0x8b   : > { %307 = vst.msk [vmem:[%s570_s25 + $0x8] sm:$0xff] %vm232_vm1, %v299_v9  ;;  %234 = vst.msk [vmem:[%s570_s25 + $0x10] sm:$0xff] %vm232_vm1, %v226_v10 }
  0x8e   : > { %v301_v11 = vpop.permute.xlu0 %300  ;;  %v228_v12 = vpop.permute.xlu1 %227 }
  0x8f   : > { %308 = vst.msk [vmem:[%s570_s25 + $0x18] sm:$0xff] %vm232_vm1, %v301_v11  ;;  %235 = vst.msk [vmem:[%s570_s25 + $0x20] sm:$0xff] %vm232_vm1, %v228_v12 }
  0x92   : > { %v303_v13 = vpop.permute.xlu0 %302  ;;  %v243_v14 = vpop.permute.xlu1 %242 }
  0x93   : > { %309 = vst.msk [vmem:[%s570_s25 + $0x28] sm:$0xff] %vm232_vm1, %v303_v13 }
  0x94   : > { %252 = vst.msk [vmem:[%s570_s25] sm:$0xff] %vm251_vm2, %v243_v14 }
  0x96   : > { %v317_v15 = vpop.permute.xlu0 %316  ;;  %v245_v16 = vpop.permute.xlu1 %244 }
  0x97   : > { %325 = vst.msk [vmem:[%s570_s25 + $0x8] sm:$0xff] %vm251_vm2, %v317_v15  ;;  %253 = vst.msk [vmem:[%s570_s25 + $0x10] sm:$0xff] %vm251_vm2, %v245_v16 }
  0x9a   : > { %v319_v17 = vpop.permute.xlu0 %318  ;;  %v247_v18 = vpop.permute.xlu1 %246 }
  0x9b   : > { %326 = vst.msk [vmem:[%s570_s25 + $0x18] sm:$0xff] %vm251_vm2, %v319_v17  ;;  %254 = vst.msk [vmem:[%s570_s25 + $0x20] sm:$0xff] %vm251_vm2, %v247_v18 }
  0x9e   : > { %v321_v19 = vpop.permute.xlu0 %320  ;;  %v262_v20 = vpop.permute.xlu1 %261 }
  0x9f   : > { %327 = vst.msk [vmem:[%s570_s25 + $0x28] sm:$0xff] %vm251_vm2, %v321_v19 }
  0xa0   : > { %271 = vst.msk [vmem:[%s570_s25] sm:$0xff] %vm270_vm3, %v262_v20 }
  0xa2   : > { %v335_v21 = vpop.permute.xlu0 %334  ;;  %v264_v22 = vpop.permute.xlu1 %263 }
  0xa3   : > { %343 = vst.msk [vmem:[%s570_s25 + $0x8] sm:$0xff] %vm270_vm3, %v335_v21  ;;  %272 = vst.msk [vmem:[%s570_s25 + $0x10] sm:$0xff] %vm270_vm3, %v264_v22 }
  0xa6   : > { %v337_v23 = vpop.permute.xlu0 %336  ;;  %v266_v24 = vpop.permute.xlu1 %265 }
  0xa7   : > { %344 = vst.msk [vmem:[%s570_s25 + $0x18] sm:$0xff] %vm270_vm3, %v337_v23  ;;  %273 = vst.msk [vmem:[%s570_s25 + $0x20] sm:$0xff] %vm270_vm3, %v266_v24 }
  0xaa   : > { %v339_v25 = vpop.permute.xlu0 %338 }
  0xab   : > { %345 = vst.msk [vmem:[%s570_s25 + $0x28] sm:$0xff] %vm270_vm3, %v339_v25 }
  0xac PF: > { %s12_s11 = sadd.s32 1, %s516_s11   ;;  %s632_s9 = smov %s512_s10 }
  0xad   : > { %p9_p5 = scmp.ge.s32.totalorder %s12_s11, 4   ;;  %s633_s10 = smov %s635_s12 }
  0xaf   :  { %11 = sbr.rel (!%p9_p5) target bundleno = 2 (0x2), region = 61 }

</bundles_post_ra>
